<compile_context>
chip_gen: v7x
topology: tpu7x:2x2x1
jax: 0.10.0
libtpu: 0.0.40
codegen_flags: <defaults>
</compile_context>

<pallas_src>
import jax
import jax.numpy as jnp
from jax.experimental import pallas as pl
from jax.experimental.pallas import tpu as pltpu


def _round_up(x, m):
    return (x + m - 1) // m * m


def readout_kernel(h_ref, x_ref, batch_ref, w1_ref, b1_ref, w2_ref, b2_ref,
                   out_ref, acc_ref, feat_ref):
    """One node tile of one node-range split.

    h_ref:     [TN, hidden] bf16        x_ref: [TN, emb] bf16
    batch_ref: [1, TN] int32 graph ids (lane-major; == num_graphs on pad rows)
    w1_ref:    [hidden+emb, 256] bf16   b1_ref: [1, 256] f32
    w2_ref:    [256, 64] bf16           b2_ref: [1, 64] f32
    out_ref:   [1, G, 64] f32 pooled partial for this split (written once)
    acc_ref:   [G, 64] f32 persistent pooled-sum accumulator (VMEM scratch)
    feat_ref:  [TN, hidden+emb] bf16 scratch holding the fused concat LHS
    """
    i = pl.program_id(1)

    @pl.when(i == 0)
    def _init():
        acc_ref[...] = jnp.zeros_like(acc_ref)

    hidden = h_ref.shape[1]
    emb = x_ref.shape[1]

    # ---- fused concat: pack [h | x] lane-contiguously -> one layer-1 matmul ----
    feat_ref[:, 0:hidden] = h_ref[...]
    feat_ref[:, hidden:hidden + emb] = x_ref[...]

    # ---- MLP layer 1: single MXU pass, f32 accumulate, fused bias+ReLU+cast ----
    h1 = jnp.dot(feat_ref[...], w1_ref[...], preferred_element_type=jnp.float32)
    h1 = jnp.maximum(h1 + b1_ref[...], 0.0).astype(jnp.bfloat16)      # [TN, 256]

    # ---- MLP layer 2 ----
    h2 = jnp.dot(h1, w2_ref[...], preferred_element_type=jnp.float32)
    h2 = jnp.maximum(h2 + b2_ref[...], 0.0)                           # [TN, 64] f32

    # ---- global_add_pool: canonical [G,TN] @ [TN,64] contraction in f32 ----
    g = acc_ref.shape[0]
    tn = h_ref.shape[0]
    gids = jax.lax.broadcasted_iota(jnp.int32, (g, tn), 0)
    one_hot = (batch_ref[...] == gids).astype(jnp.float32)            # [G, TN]
    acc_ref[...] += jax.lax.dot_general(
        one_hot, h2,
        dimension_numbers=(((1,), (0,)), ((), ())),
        preferred_element_type=jnp.float32)                           # [G, 64]

    @pl.when(i == pl.num_programs(1) - 1)
    def _finalize():
        out_ref[0] = acc_ref[...]


def readout_forward(h, x, batch, params, num_graphs, *, block_n=2048,
                    num_splits=2):
    """h: [N, hidden_dim], x: [N, emb_size], batch: [N] int32 graph ids."""
    w1, b1, w2, b2, w3, b3 = params
    n, hidden_dim = h.shape
    emb_size = x.shape[1]
    d_in = hidden_dim + emb_size

    # Node tiling: tn is a multiple of 128 (lane-major batch tile), N padded so
    # the grid is (num_splits, inner).  Padded rows get graph id == num_graphs
    # so their one-hot column is all zeros.
    tn = _round_up(min(block_n, max(n, 1)), 128)
    n_pad = _round_up(n, tn * num_splits)
    inner = n_pad // (tn * num_splits)
    pad = n_pad - n

    hb = jnp.pad(h.astype(jnp.bfloat16), ((0, pad), (0, 0)))
    xb = jnp.pad(x.astype(jnp.bfloat16), ((0, pad), (0, 0)))
    batch_row = jnp.pad(batch.astype(jnp.int32), (0, pad),
                        constant_values=num_graphs)[None, :]          # [1, N_pad]

    node_map = lambda c, i: (c * inner + i, 0)
    batch_map = lambda c, i: (0, c * inner + i)
    fixed = lambda c, i: (0, 0)
    out_map = lambda c, i: (c, 0, 0)

    partial = pl.pallas_call(
        readout_kernel,
        out_shape=jax.ShapeDtypeStruct((num_splits, num_graphs, 64), jnp.float32),
        grid=(num_splits, inner),
        in_specs=[
            pl.BlockSpec((tn, hidden_dim), node_map),                 # h tile
            pl.BlockSpec((tn, emb_size), node_map),                   # x tile
            pl.BlockSpec((1, tn), batch_map),                         # batch ids (lane-major)
            pl.BlockSpec((d_in, 256), fixed),                         # W1
            pl.BlockSpec((1, 256), fixed),                            # b1
            pl.BlockSpec((256, 64), fixed),                           # W2
            pl.BlockSpec((1, 64), fixed),                             # b2
        ],
        out_specs=pl.BlockSpec((1, num_graphs, 64), out_map),
        scratch_shapes=[pltpu.VMEM((num_graphs, 64), jnp.float32),
                        pltpu.VMEM((tn, d_in), jnp.bfloat16)],
        compiler_params=pltpu.CompilerParams(
            dimension_semantics=("parallel", "arbitrary"),
            vmem_limit_bytes=32 * 1024 * 1024),
    )(hb, xb, batch_row,
      w1.astype(jnp.bfloat16), b1.astype(jnp.float32)[None, :],
      w2.astype(jnp.bfloat16), b2.astype(jnp.float32)[None, :])

    # Tiny epilogue: combine per-split partials, out_fn (Linear 64->1), sigmoid.
    pooled = jnp.sum(partial, axis=0)                                 # [G, 64]
    logits = pooled @ w3.astype(jnp.float32) + b3.astype(jnp.float32) # [G, 1]
    return jnp.squeeze(jax.nn.sigmoid(logits))   # matches torch .squeeze(): [G]


def init_params(key, emb_size, hidden_dim):
    d_in = hidden_dim + emb_size
    k1, k2, k3, k4, k5, k6 = jax.random.split(key, 6)
    w1 = 0.05 * jax.random.normal(k1, (d_in, 256), jnp.float32)
    b1 = 0.05 * jax.random.normal(k2, (256,), jnp.float32)
    w2 = 0.05 * jax.random.normal(k3, (256, 64), jnp.float32)
    b2 = 0.05 * jax.random.normal(k4, (64,), jnp.float32)
    w3 = 0.05 * jax.random.normal(k5, (64, 1), jnp.float32)
    b3 = 0.05 * jax.random.normal(k6, (1,), jnp.float32)
    return (w1, b1, w2, b2, w3, b3)


def _reference(h, x, batch, params, num_graphs):
    w1, b1, w2, b2, w3, b3 = params
    feat = jnp.concatenate([h, x], axis=-1)
    feat = jax.nn.relu(feat @ w1 + b1)
    feat = jax.nn.relu(feat @ w2 + b2)
    pooled = jax.ops.segment_sum(feat, batch, num_segments=num_graphs)
    return jnp.squeeze(jax.nn.sigmoid(pooled @ w3 + b3))


if __name__ == "__main__":
    emb_size, hidden_dim = 8, 32
    num_nodes, num_graphs = 512, 3

    key = jax.random.PRNGKey(0)
    kh, kx, kp = jax.random.split(key, 3)
    h = jax.random.normal(kh, (num_nodes, hidden_dim), jnp.float32)
    x = jax.random.normal(kx, (num_nodes, emb_size), jnp.float32)
    batch = (jnp.arange(num_nodes) * num_graphs // num_nodes).astype(jnp.int32)
    params = init_params(kp, emb_size, hidden_dim)

    ref = _reference(h, x, batch, params, num_graphs)

    # Small tiles -> grid (2 splits, 2 inner steps): exercises the accumulator path.
    out = readout_forward(h, x, batch, params, num_graphs, block_n=128)
    out = jax.block_until_ready(out)
    assert out.shape == (num_graphs,)
    assert jnp.allclose(out, ref, atol=1e-2, rtol=1e-2)

    # Default (large) tile: single inner step + padded tail nodes.
    out2 = readout_forward(h, x, batch, params, num_graphs)
    out2 = jax.block_until_ready(out2)
    assert jnp.allclose(out2, ref, atol=1e-2, rtol=1e-2)

    print("KERNEL_OK")
</pallas_src>

<mosaic_0001>
module attributes {stable_mosaic.version = 11 : i64} {
  func.func @readout_kernel(%arg0: i32, %arg1: i32, %arg2: memref<128x32xbf16, #tpu.memory_space<vmem>>, %arg3: memref<128x8xbf16, #tpu.memory_space<vmem>>, %arg4: memref<1x128xi32, #tpu.memory_space<vmem>>, %arg5: memref<40x256xbf16, #tpu.memory_space<vmem>>, %arg6: memref<1x256xf32, #tpu.memory_space<vmem>>, %arg7: memref<256x64xbf16, #tpu.memory_space<vmem>>, %arg8: memref<1x64xf32, #tpu.memory_space<vmem>>, %arg9: memref<1x3x64xf32, #tpu.memory_space<vmem>>, %arg10: memref<3x64xf32, #tpu.memory_space<vmem>>, %arg11: memref<128x40xbf16, #tpu.memory_space<vmem>>) attributes {dimension_semantics = [#tpu.dimension_semantics<parallel>, #tpu.dimension_semantics<arbitrary>], iteration_bounds = array<i64: 2, 2>, scalar_prefetch = 0 : i64, scratch_operands = 2 : i64, tpu.core_type = #tpu.core_type<tc>, window_params = [{transform_indices = @transform_0, window_bounds = array<i64: 128, 32>}, {transform_indices = @transform_1, window_bounds = array<i64: 128, 8>}, {transform_indices = @transform_2, window_bounds = array<i64: 1, 128>}, {pipeline_mode = #tpu.pipeline_mode<synchronous>, transform_indices = @transform_3, window_bounds = array<i64: 40, 256>}, {pipeline_mode = #tpu.pipeline_mode<synchronous>, transform_indices = @transform_4, window_bounds = array<i64: 1, 256>}, {pipeline_mode = #tpu.pipeline_mode<synchronous>, transform_indices = @transform_5, window_bounds = array<i64: 256, 64>}, {pipeline_mode = #tpu.pipeline_mode<synchronous>, transform_indices = @transform_6, window_bounds = array<i64: 1, 64>}, {transform_indices = @transform_7, window_bounds = array<i64: 1, 3, 64>}]} {
    %c0_i32 = arith.constant 0 : i32
    %0 = arith.cmpi eq, %arg1, %c0_i32 : i32
    %1 = arith.extui %0 : i1 to i32
    %c0_i32_0 = arith.constant 0 : i32
    %2 = arith.cmpi ne, %1, %c0_i32_0 : i32
    scf.if %2 {
      %cst_28 = arith.constant 0.000000e+00 : f32
      %36 = vector.broadcast %cst_28 : f32 to vector<3x64xf32>
      %c0_29 = arith.constant 0 : index
      %c0_30 = arith.constant 0 : index
      %37 = vector.load %arg10[%c0_29, %c0_30] : memref<3x64xf32, #tpu.memory_space<vmem>>, vector<3x64xf32>
      tpu.vector_store %arg10[%c0_29, %c0_30], %36 {strides = array<i32>} : memref<3x64xf32, #tpu.memory_space<vmem>>, vector<3x64xf32>,
    } else {
    }
    %c0 = arith.constant 0 : index
    %c0_1 = arith.constant 0 : index
    %3 = vector.load %arg2[%c0, %c0_1] : memref<128x32xbf16, #tpu.memory_space<vmem>>, vector<128x32xbf16>
    %c0_2 = arith.constant 0 : index
    %c0_3 = arith.constant 0 : index
    %4 = vector.load %arg11[%c0_2, %c0_3] : memref<128x40xbf16, #tpu.memory_space<vmem>>, vector<128x32xbf16>
    tpu.vector_store %arg11[%c0_2, %c0_3], %3 {strides = array<i32>} : memref<128x40xbf16, #tpu.memory_space<vmem>>, vector<128x32xbf16>,
    %c0_4 = arith.constant 0 : index
    %c0_5 = arith.constant 0 : index
    %5 = vector.load %arg3[%c0_4, %c0_5] : memref<128x8xbf16, #tpu.memory_space<vmem>>, vector<128x8xbf16>
    %c0_6 = arith.constant 0 : index
    %c32 = arith.constant 32 : index
    %6 = vector.load %arg11[%c0_6, %c32] : memref<128x40xbf16, #tpu.memory_space<vmem>>, vector<128x8xbf16>
    tpu.vector_store %arg11[%c0_6, %c32], %5 {strides = array<i32>} : memref<128x40xbf16, #tpu.memory_space<vmem>>, vector<128x8xbf16>,
    %c0_7 = arith.constant 0 : index
    %c0_8 = arith.constant 0 : index
    %7 = vector.load %arg11[%c0_7, %c0_8] : memref<128x40xbf16, #tpu.memory_space<vmem>>, vector<128x40xbf16>
    %c0_9 = arith.constant 0 : index
    %c0_10 = arith.constant 0 : index
    %8 = vector.load %arg5[%c0_9, %c0_10] : memref<40x256xbf16, #tpu.memory_space<vmem>>, vector<40x256xbf16>
    %cst = arith.constant dense<0.000000e+00> : vector<128x256xf32>
    %9 = tpu.matmul %7, %8, %cst {dimension_numbers = #tpu.dot_dimension_numbers<[1], [0], [0], [1], [0, 0, 1, 1], [], []>} : vector<128x40xbf16>, vector<40x256xbf16>, vector<128x256xf32> -> vector<128x256xf32>
    %c0_11 = arith.constant 0 : index
    %c0_12 = arith.constant 0 : index
    %10 = vector.load %arg6[%c0_11, %c0_12] : memref<1x256xf32, #tpu.memory_space<vmem>>, vector<1x256xf32>
    %11 = vector.broadcast %10 : vector<1x256xf32> to vector<128x256xf32>
    %12 = arith.addf %9, %11 : vector<128x256xf32>
    %cst_13 = arith.constant 0.000000e+00 : f32
    %13 = vector.broadcast %cst_13 : f32 to vector<128x256xf32>
    %14 = arith.maximumf %12, %13 : vector<128x256xf32>
    %15 = arith.truncf %14 : vector<128x256xf32> to vector<128x256xbf16>
    %c0_14 = arith.constant 0 : index
    %c0_15 = arith.constant 0 : index
    %16 = vector.load %arg7[%c0_14, %c0_15] : memref<256x64xbf16, #tpu.memory_space<vmem>>, vector<256x64xbf16>
    %cst_16 = arith.constant dense<0.000000e+00> : vector<128x64xf32>
    %17 = tpu.matmul %15, %16, %cst_16 {dimension_numbers = #tpu.dot_dimension_numbers<[1], [0], [0], [1], [0, 0, 1, 1], [], []>} : vector<128x256xbf16>, vector<256x64xbf16>, vector<128x64xf32> -> vector<128x64xf32>
    %c0_17 = arith.constant 0 : index
    %c0_18 = arith.constant 0 : index
    %18 = vector.load %arg8[%c0_17, %c0_18] : memref<1x64xf32, #tpu.memory_space<vmem>>, vector<1x64xf32>
    %19 = vector.broadcast %18 : vector<1x64xf32> to vector<128x64xf32>
    %20 = arith.addf %17, %19 : vector<128x64xf32>
    %cst_19 = arith.constant 0.000000e+00 : f32
    %21 = vector.broadcast %cst_19 : f32 to vector<128x64xf32>
    %22 = arith.maximumf %20, %21 : vector<128x64xf32>
    %23 = tpu.iota {dimensions = array<i32: 0>} : vector<3x128xi32>
    %c0_20 = arith.constant 0 : index
    %c0_21 = arith.constant 0 : index
    %24 = vector.load %arg4[%c0_20, %c0_21] : memref<1x128xi32, #tpu.memory_space<vmem>>, vector<1x128xi32>
    %25 = vector.broadcast %24 : vector<1x128xi32> to vector<3x128xi32>
    %26 = arith.cmpi eq, %25, %23 : vector<3x128xi32>
    %27 = arith.extui %26 : vector<3x128xi1> to vector<3x128xi32>
    %28 = arith.sitofp %27 : vector<3x128xi32> to vector<3x128xf32>
    %c0_22 = arith.constant 0 : index
    %c0_23 = arith.constant 0 : index
    %29 = vector.load %arg10[%c0_22, %c0_23] : memref<3x64xf32, #tpu.memory_space<vmem>>, vector<3x64xf32>
    %cst_24 = arith.constant dense<0.000000e+00> : vector<3x64xf32>
    %30 = tpu.matmul %28, %22, %cst_24 {dimension_numbers = #tpu.dot_dimension_numbers<[1], [0], [0], [1], [0, 0, 1, 1], [], []>} : vector<3x128xf32>, vector<128x64xf32>, vector<3x64xf32> -> vector<3x64xf32>
    %31 = arith.addf %29, %30 : vector<3x64xf32>
    %c0_25 = arith.constant 0 : index
    %c0_26 = arith.constant 0 : index
    %32 = vector.load %arg10[%c0_25, %c0_26] : memref<3x64xf32, #tpu.memory_space<vmem>>, vector<3x64xf32>
    tpu.vector_store %arg10[%c0_25, %c0_26], %31 {strides = array<i32>} : memref<3x64xf32, #tpu.memory_space<vmem>>, vector<3x64xf32>,
    %c1_i32 = arith.constant 1 : i32
    %33 = arith.cmpi eq, %arg1, %c1_i32 : i32
    %34 = arith.extui %33 : i1 to i32
    %c0_i32_27 = arith.constant 0 : i32
    %35 = arith.cmpi ne, %34, %c0_i32_27 : i32
    scf.if %35 {
      %c0_28 = arith.constant 0 : index
      %c0_29 = arith.constant 0 : index
      %36 = vector.load %arg10[%c0_28, %c0_29] : memref<3x64xf32, #tpu.memory_space<vmem>>, vector<3x64xf32>
      %c0_30 = arith.constant 0 : index
      %c0_31 = arith.constant 0 : index
      %c0_32 = arith.constant 0 : index
      %37 = vector.load %arg9[%c0_30, %c0_31, %c0_32] : memref<1x3x64xf32, #tpu.memory_space<vmem>>, vector<1x3x64xf32>
      %38 = vector.shape_cast %37 : vector<1x3x64xf32> to vector<3x64xf32>
      %39 = vector.shape_cast %36 : vector<3x64xf32> to vector<1x3x64xf32>
      tpu.vector_store %arg9[%c0_30, %c0_31, %c0_32], %39 {strides = array<i32>} : memref<1x3x64xf32, #tpu.memory_space<vmem>>, vector<1x3x64xf32>,
    } else {
    }
    return
  }
  func.func @transform_0(%arg0: i32, %arg1: i32) -> (i32, i32) {
    %c2_i32 = arith.constant 2 : i32
    %0 = arith.muli %arg0, %c2_i32 : i32
    %1 = arith.addi %0, %arg1 : i32
    %c0_i32 = arith.constant 0 : i32
    %c0_i32_0 = arith.constant 0 : i32
    return %1, %c0_i32 : i32, i32
  }
  func.func @transform_1(%arg0: i32, %arg1: i32) -> (i32, i32) {
    %c2_i32 = arith.constant 2 : i32
    %0 = arith.muli %arg0, %c2_i32 : i32
    %1 = arith.addi %0, %arg1 : i32
    %c0_i32 = arith.constant 0 : i32
    %c0_i32_0 = arith.constant 0 : i32
    return %1, %c0_i32 : i32, i32
  }
  func.func @transform_2(%arg0: i32, %arg1: i32) -> (i32, i32) {
    %c2_i32 = arith.constant 2 : i32
    %0 = arith.muli %arg0, %c2_i32 : i32
    %1 = arith.addi %0, %arg1 : i32
    %c0_i32 = arith.constant 0 : i32
    %c0_i32_0 = arith.constant 0 : i32
    return %c0_i32, %1 : i32, i32
  }
  func.func @transform_3(%arg0: i32, %arg1: i32) -> (i32, i32) {
    %c0_i32 = arith.constant 0 : i32
    %c0_i32_0 = arith.constant 0 : i32
    %c0_i32_1 = arith.constant 0 : i32
    return %c0_i32, %c0_i32_0 : i32, i32
  }
  func.func @transform_4(%arg0: i32, %arg1: i32) -> (i32, i32) {
    %c0_i32 = arith.constant 0 : i32
    %c0_i32_0 = arith.constant 0 : i32
    %c0_i32_1 = arith.constant 0 : i32
    return %c0_i32, %c0_i32_0 : i32, i32
  }
  func.func @transform_5(%arg0: i32, %arg1: i32) -> (i32, i32) {
    %c0_i32 = arith.constant 0 : i32
    %c0_i32_0 = arith.constant 0 : i32
    %c0_i32_1 = arith.constant 0 : i32
    return %c0_i32, %c0_i32_0 : i32, i32
  }
  func.func @transform_6(%arg0: i32, %arg1: i32) -> (i32, i32) {
    %c0_i32 = arith.constant 0 : i32
    %c0_i32_0 = arith.constant 0 : i32
    %c0_i32_1 = arith.constant 0 : i32
    return %c0_i32, %c0_i32_0 : i32, i32
  }
  func.func @transform_7(%arg0: i32, %arg1: i32) -> (i32, i32, i32) {
    %c0_i32 = arith.constant 0 : i32
    %c0_i32_0 = arith.constant 0 : i32
    %c0_i32_1 = arith.constant 0 : i32
    return %arg0, %c0_i32, %c0_i32_0 : i32, i32, i32
  }
}

</mosaic_0001>

<bundles_post_ra>
// kernel: tpu_custom_call.1
= control target key start
LH: loop header
LB: loop body
LE: loop exit
PB: predicated region body
PF: predicated region fallthrough
CT: control target
= control target key end

     0   :  { %s1592_s24 = smov 0   ;;  %s1594_s25 = smov 0   ;;  %s1851_s0 = inlined_call_operand.vmem [shape: bf16[512,32], index: 0, kind: input, shape index: {}]   ;;  %s1852_s1 = inlined_call_operand.vmem [shape: bf16[512,8], index: 1, kind: input, shape index: {}]   ;;  %s1853_s2 = inlined_call_operand.vmem [shape: s32[1,512], index: 2, kind: input, shape index: {}]   ;;  %s1854_s3 = inlined_call_operand.vmem [shape: bf16[40,256], index: 3, kind: input, shape index: {}]   ;;  %s1855_s4 = inlined_call_operand.vmem [shape: f32[1,256], index: 4, kind: input, shape index: {}]   ;;  %s1856_s5 = inlined_call_operand.vmem [shape: bf16[256,64], index: 5, kind: input, shape index: {}]   ;;  %s1857_s6 = inlined_call_operand.vmem [shape: f32[1,64], index: 6, kind: input, shape index: {}]   ;;  %s1858_s7 = inlined_call_operand.vmem [shape: f32[2,3,64], index: 7, kind: output, shape index: {}]  }
   0x1   :  { %s1596_s26 = smov 0   ;;  %s1598_s27 = smov 0  }
   0x2   :  { %s1600_s28 = smov 0  }
   0x3 LB: > { %s26_s29 = sadd.s32 1, %s1535_s26  ;;  %s29_s30 = sadd.s32 1, %s1539_s27  ;;  %s1543_s28 = sphi %s1600_s28, %s17_s28   ;;  %s1539_s27 = sphi %s1598_s27, %s1862_s27   ;;  %s1535_s26 = sphi %s1596_s26, %s1861_s26   ;;  %s1531_s25 = sphi %s1594_s25, %s1860_s25   ;;  %s1527_s24 = sphi %s1592_s24, %s1859_s24  }
   0x4   : > { %p27_p0 = scmp.ge.s32.totalorder %s26_s29, 2  ;;  %p1214_p1 = scmp.ge.s32.totalorder %s1543_s28, 1 }
   0x5   : > { %p293_p2 = scmp.lt.s32.totalorder %s1543_s28, 5 }
   0x6   : > { %s1864_s29 = smov (%p27_p0, %s26_s29), 0  ;;  %s1866_s30 = smov (!%p27_p0, %s29_s30), %s1539_s27 }
   0x7   : > { %p294_p3 = pnand %p1214_p1, %p293_p2  ;;  %p31_p4 = scmp.ge.s32.totalorder %s1866_s30, 2 }
   0x8   : > { %s1215_s8 = sshll.u32 (!%p294_p3), %s1531_s25, 1  ;;  %p365_p7 = scmp.lt.s32.totalorder (!%p294_p3), %s1531_s25, 1 }
   0x9   : > { %s1868_s30 = smov (%p31_p4, %s1866_s30), 0  ;;  %297 = sbr.rel (%p294_p3) target bundleno = 877 (0x36d), region = 48 }
   0xa   : > { %s339_s9 = sadd.s32 (!%p294_p3), %s1527_s24, %s1215_s8  ;;  %p1223_p8 = scmp.ne.s32.totalorder (!%p294_p3), %s1527_s24, 0 }
   0xb   : > { %s1216_s10 = sshll.u32 (!%p294_p3), %s339_s9, 4  ;;  %p360_p5 = scmp.lt.s32.totalorder (!%p294_p3), %s339_s9, 3 }
   0xc   : > { %p341_p6 = scmp.lt.s32.totalorder (!%p294_p3), %s1216_s10, 63 }
  0x10   : > { %s1870_s9 = smov (!%p360_p5, %s339_s9), 3  ;;  %s1872_s10 = smov (!%p341_p6, %s1216_s10), 63 }
  0x11   : > { %s362_s13 = scalar_lea.vmem %s1853_s2, %s1870_s9  ;;  %s1217_s14 = sshll.u32 %s1872_s10, 2  ;;  %vm374_vm0 = vcmask (!%p1223_p8), 518144   ;;  %v1545_v0 = vmov (!%p1223_p8), 0.0  }
  0x12   : > { %s1634_s17 = scalar_lea.vmem %s1851_s0, %s1217_s14  ;;  %s354_s20 = scalar_lea.vmem %s1852_s1, %s1217_s14  ;;  %375 = vst.msk [vmem:[#allocation2] sm:$0x7] (!%p1223_p8), %vm374_vm0, %v1545_v0 }
  0x13   : > { %s1874_s25 = smov (!%p365_p7, %s1531_s25), 1  ;;  %373 = sbr.rel (%p1223_p8) target bundleno = 26 (0x1a), region = 52 }
  0x14   : > { %s1222_s21 = sshll.u32 %s1874_s25, 2 }
  0x15   : > { %s1642_s8 = scalar_lea.vmem %s1858_s7, %s1222_s21 }
  0x1a PF: > { %v1465_v1 = vld [vmem:[%s354_s20] sm:$0xff]   ;;  %v1466_v2 = vld [vmem:[%s354_s20 + $0x8] sm:$0xff]   ;;  %s1546_s10 = smov 32   ;;  %v1467_v3 = vld [vmem:[%s354_s20 + $0x10] sm:$0xff]   ;;  %v1547_v5 = vmov 0   ;;  %vm440_vm1 = vcmask 261120   ;;  %v553_v58 = vlaneseq }
  0x1b   : > { %505 = vrot.lane.b32.xlu0 %v1465_v1, %s1546_s10  ;;  %509 = vrot.lane.b32.xlu1 %v1467_v3, %s1546_s10  ;;  %v1468_v4 = vld [vmem:[%s354_s20 + $0x18] sm:$0xff]   ;;  %v1469_v6 = vld [vmem:[%s354_s20 + $0x20] sm:$0xff]   ;;  %vm613_vm2 = vcmask 1043456   ;;  %vm529_vm3 = vcmask 326912   ;;  %vm588_vm4 = vcmask 326656   ;;  %vm1549_vm5 = vmmov 0  }
  0x1c   : > { %652 = vmatprep.mubr.bf16.mxu0 %v1547_v5  ;;  %v1470_v7 = vld [vmem:[%s354_s20 + $0x28] sm:$0xff]   ;;  %v1471_v8 = vld [vmem:[%s354_s20 + $0x30] sm:$0xff]   ;;  %v1472_v11 = vld [vmem:[%s354_s20 + $0x38] sm:$0xff]   ;;  %v1756_v59 = vshrl.u32 %v553_v58, 7  ;;  %vm1111_vm7 = vcmask 518144   ;;  %p1275_p9 = scmp.ne.s32.totalorder %s1527_s24, 1 }
  0x1d   : > { %v1473_v9 = vld [vmem:[%s1854_s3 + $0x4] ss:$8 sps:$4 sm:$0xff]   ;;  %v1475_v10 = vld [vmem:[%s1854_s3] ss:$8 sps:$4 sm:$0xff]   ;;  %v1477_v13 = vld [vmem:[%s1854_s3 + $0x14] ss:$8 sps:$4 sm:$0xff]  }
  0x1e   : > { %620 = vmatprep.subr.bf16.mxu0 %v1473_v9  ;;  %v1476_v12 = vld [vmem:[%s1634_s17] sm:$0xff]   ;;  %v1479_v14 = vld [vmem:[%s1854_s3 + $0x10] ss:$8 sps:$4 sm:$0xff]   ;;  %v1482_v18 = vld [vmem:[%s1634_s17 + $0x8] sm:$0xff]   ;;  %v555_v60 = vsub.s32 0, %v1756_v59  ;;  %v559_v62 = vsub.s32 1, %v1756_v59 }
  0x1f   : > { %507 = vrot.lane.b32.xlu0 %v1466_v2, %s1546_s10  ;;  %511 = vrot.lane.b32.xlu1 %v1468_v4, %s1546_s10  ;;  %v550_v15 = vld [vmem:[%s1854_s3 + $0x20] sm:$0xff]  ;;  %441 = vst.msk [vmem:[#allocation3] sm:$0xff] %vm440_vm1, %v1476_v12  ;;  %v1483_v19 = vld [vmem:[%s1634_s17 + $0x10] sm:$0xff]   ;;  %442 = vst.msk [vmem:[#allocation3 + $0x8] sm:$0xff] %vm440_vm1, %v1482_v18 }
  0x20   : > { %621 = vmatpush1.bf16.msra.mxu0 %v1475_v10  ;;  %v1245_v16 = vcombine.high %v550_v15, %v550_v15  ;;  %v1244_v17 = vcombine.low %v550_v15, %v550_v15  ;;  %v1484_v20 = vld [vmem:[%s1634_s17 + $0x18] sm:$0xff]   ;;  %443 = vst.msk [vmem:[#allocation3 + $0x10] sm:$0xff] %vm440_vm1, %v1483_v19  ;;  %v1485_v22 = vld [vmem:[%s1634_s17 + $0x20] sm:$0xff]   ;;  %v1486_v23 = vld [vmem:[%s1634_s17 + $0x28] sm:$0xff]  }
  0x21   : > { %622 = vmatprep.subr.bf16.mxu0 %v1477_v13  ;;  %444 = vst.msk [vmem:[#allocation3 + $0x18] sm:$0xff] %vm440_vm1, %v1484_v20  ;;  %445 = vst.msk [vmem:[#allocation3 + $0x20] sm:$0xff] %vm440_vm1, %v1485_v22  ;;  %v1487_v24 = vld [vmem:[%s1634_s17 + $0x30] sm:$0xff]   ;;  %v1488_v25 = vld [vmem:[%s1634_s17 + $0x38] sm:$0xff]  }
  0x22   : > { %v615_v21 = vsel %vm613_vm2, %v1244_v17, 0  ;;  %446 = vst.msk [vmem:[#allocation3 + $0x28] sm:$0xff] %vm440_vm1, %v1486_v23  ;;  %447 = vst.msk [vmem:[#allocation3 + $0x30] sm:$0xff] %vm440_vm1, %v1487_v24  ;;  %v1489_v26 = vld [vmem:[%s1856_s5 + $0x40] sm:$0xff]   ;;  %v1491_v28 = vld [vmem:[%s1856_s5 + $0x48] sm:$0xff]  }
  0x23   : > { %513 = vrot.lane.b32.xlu0 %v1469_v6, %s1546_s10  ;;  %515 = vrot.lane.b32.xlu1 %v1470_v7, %s1546_s10  ;;  %448 = vst.msk [vmem:[#allocation3 + $0x38] sm:$0xff] %vm440_vm1, %v1488_v25  ;;  %v1490_v27 = vld [vmem:[%s1856_s5] sm:$0xff]   ;;  %v1492_v29 = vld [vmem:[%s1856_s5 + $0x8] sm:$0xff]  }
  0x24   : > { %623 = vmatpush1.bf16.msra.mxu0 %v1479_v14  ;;  %1278 = vmatprep.subr.bf16.mxu1 %v1489_v26  ;;  %v1493_v30 = vld [vmem:[%s1856_s5 + $0x50] sm:$0xff]   ;;  %v1495_v32 = vld [vmem:[%s1856_s5 + $0x58] sm:$0xff]   ;;  %v1497_v34 = vld [vmem:[%s1856_s5 + $0x60] sm:$0xff]  }
  0x25   : > { %1246 = vmatprep.subr.msk.bf16.mxu0 %vm613_vm2, %v1245_v16  ;;  %1279 = vmatpush3.bf16.msra.mxu1 %v1490_v27  ;;  %v1494_v31 = vld [vmem:[%s1856_s5 + $0x10] sm:$0xff]   ;;  %v1496_v33 = vld [vmem:[%s1856_s5 + $0x18] sm:$0xff]   ;;  %v1498_v35 = vld [vmem:[%s1856_s5 + $0x20] sm:$0xff]  }
  0x26   : > { %1280 = vmatprep.subr.bf16.mxu1 %v1491_v28  ;;  %v1499_v36 = vld [vmem:[%s1856_s5 + $0x68] sm:$0xff]   ;;  %v1501_v54 = vld [vmem:[%s1856_s5 + $0x70] sm:$0xff]   ;;  %v1503_v56 = vld [vmem:[%s1856_s5 + $0x78] sm:$0xff]  }
  0x27   : > { %517 = vrot.lane.b32.xlu0 %v1471_v8, %s1546_s10  ;;  %519 = vrot.lane.b32.xlu1 %v1472_v11, %s1546_s10  ;;  %v1500_v53 = vld [vmem:[%s1856_s5 + $0x28] sm:$0xff]   ;;  %v1502_v55 = vld [vmem:[%s1856_s5 + $0x30] sm:$0xff]  }
  0x28   : > { %625 = vmatpush1.bf16.msra.mxu0 %v615_v21  ;;  %v1504_v57 = vld [vmem:[%s1856_s5 + $0x38] sm:$0xff]   ;;  %v551_v61 = vld [vmem:[%s1855_s4] sm:$0x3] }
  0x29   : > { %1281 = vmatpush3.bf16.msra.mxu1 %v1492_v29  ;;  %v1763_v63 = vrot.slane %v551_v61, %v555_v60  ;;  %v1765_v0 = vrot.slane %v551_v61, %v559_v62 }
  0x2a   : > { %1282 = vmatprep.subr.bf16.mxu1 %v1493_v30 }
  0x2d   : > { %1283 = vmatpush3.bf16.msra.mxu1 %v1494_v31 }
  0x2e   : > { %1284 = vmatprep.subr.bf16.mxu1 %v1495_v32 }
  0x31   : > { %1285 = vmatpush3.bf16.msra.mxu1 %v1496_v33 }
  0x32   : > { %1286 = vmatprep.subr.bf16.mxu1 %v1497_v34 }
  0x35   : > { %1287 = vmatpush3.bf16.msra.mxu1 %v1498_v35 }
  0x36   : > { %1288 = vmatprep.subr.bf16.mxu1 %v1499_v36 }
  0x39   : > { %1289 = vmatpush3.bf16.msra.mxu1 %v1500_v53 }
  0x3a   : > { %1290 = vmatprep.subr.bf16.mxu1 %v1501_v54 }
  0x3d   : > { %1291 = vmatpush3.bf16.msra.mxu1 %v1502_v55 }
  0x3e   : > { %1292 = vmatprep.subr.bf16.mxu1 %v1503_v56 }
  0x41   : > { %1293 = vmatpush3.bf16.msra.mxu1 %v1504_v57 }
  0x8d   : > { %v506_v37 = vpop.permute.xlu0 %505  ;;  %v510_v38 = vpop.permute.xlu1 %509 }
  0x8e   : > { %530 = vst.msk [vmem:[#allocation3] sm:$0xff] %vm529_vm3, %v506_v37  ;;  %532 = vst.msk [vmem:[#allocation3 + $0x10] sm:$0xff] %vm529_vm3, %v510_v38 }
  0x91   : > { %v508_v39 = vpop.permute.xlu0 %507  ;;  %v512_v40 = vpop.permute.xlu1 %511 }
  0x92   : > { %531 = vst.msk [vmem:[#allocation3 + $0x8] sm:$0xff] %vm529_vm3, %v508_v39  ;;  %533 = vst.msk [vmem:[#allocation3 + $0x18] sm:$0xff] %vm529_vm3, %v512_v40 }
  0x95   : > { %v538_v41 = vld [vmem:[#allocation3] sm:$0xff]  ;;  %v514_v42 = vpop.permute.xlu0 %513  ;;  %v516_v43 = vpop.permute.xlu1 %515  ;;  %v540_v47 = vld [vmem:[#allocation3 + $0x10] sm:$0xff] }
  0x96   : > { %1247 = vmatmul.mubr.msk.bf16.vlgmr.msra.gmra.mrb[0].mxu0 %vm588_vm4, %v538_v41  ;;  %534 = vst.msk [vmem:[#allocation3 + $0x20] sm:$0xff] %vm529_vm3, %v514_v42  ;;  %535 = vst.msk [vmem:[#allocation3 + $0x28] sm:$0xff] %vm529_vm3, %v516_v43 }
  0x97   : > { %662 = vmatprep.mubr.bf16.mxu0 %v1547_v5 }
  0x99   : > { %v518_v44 = vpop.permute.xlu0 %517  ;;  %v539_v45 = vld [vmem:[#allocation3 + $0x8] sm:$0xff]  ;;  %v520_v46 = vpop.permute.xlu1 %519  ;;  %v541_v48 = vld [vmem:[#allocation3 + $0x18] sm:$0xff] }
  0x9a   : > { %536 = vst.msk [vmem:[#allocation3 + $0x30] sm:$0xff] %vm529_vm3, %v518_v44  ;;  %537 = vst.msk [vmem:[#allocation3 + $0x38] sm:$0xff] %vm529_vm3, %v520_v46 }
  0x9d   : > { %v542_v49 = vld [vmem:[#allocation3 + $0x20] sm:$0xff]  ;;  %v543_v50 = vld [vmem:[#allocation3 + $0x28] sm:$0xff] }
  0x9e   : > { %1248 = vmatmul.mubr.msk.bf16.gmra.mrb[4].mxu0 %vm588_vm4, %v539_v45 }
  0x9f   : > { %672 = vmatprep.mubr.bf16.mxu0 %v1547_v5 }
  0xa1   : > { %v544_v51 = vld [vmem:[#allocation3 + $0x30] sm:$0xff]  ;;  %v545_v52 = vld [vmem:[#allocation3 + $0x38] sm:$0xff] }
  0xa6   : > { %1249 = vmatmul.mubr.msk.bf16.gmra.mrb[8].mxu0 %vm588_vm4, %v540_v47 }
  0xa7   : > { %682 = vmatprep.mubr.bf16.mxu0 %v1547_v5 }
  0xae   : > { %1250 = vmatmul.mubr.msk.bf16.gmra.mrb[12].mxu0 %vm588_vm4, %v541_v48 }
  0xaf   : > { %692 = vmatprep.mubr.bf16.mxu0 %v1547_v5 }
  0xb6   : > { %1251 = vmatmul.mubr.msk.bf16.gmra.mrb[16].mxu0 %vm588_vm4, %v542_v49 }
  0xb7   : > { %702 = vmatprep.mubr.bf16.mxu0 %v1547_v5 }
  0xbe   : > { %1252 = vmatmul.mubr.msk.bf16.gmra.mrb[20].mxu0 %vm588_vm4, %v543_v50 }
  0xbf   : > { %712 = vmatprep.mubr.bf16.mxu0 %v1547_v5 }
  0xc6   : > { %1253 = vmatmul.mubr.msk.bf16.gmra.mrb[24].mxu0 %vm588_vm4, %v544_v51 }
  0xc7   : > { %722 = vmatprep.mubr.bf16.mxu0 %v1547_v5 }
  0xce   : > { %1254 = vmatmul.mubr.msk.bf16.gmra.mrb[28].mxu0 %vm588_vm4, %v545_v52 }
 0x169   : > { %v654_v1 = vpop.f32.mrb[0].mxu0 }
 0x16a   : > { %v655_v2 = vadd.f32 %v654_v1, %v1763_v63  ;;  %v656_v3 = vpop.f32.mrb[1].mxu0 }
 0x16b   : > { %v657_v4 = vadd.f32 %v656_v3, %v1765_v0  ;;  %v658_v5 = vpop.f32.mrb[2].mxu0 }
 0x16c   : > { %v659_v6 = vadd.f32 %v658_v5, %v1763_v63  ;;  %v660_v7 = vpop.f32.mrb[3].mxu0  ;;  %v733_v9 = vmax.f32 %v655_v2, 0.0 }
 0x16d   : > { %v661_v8 = vadd.f32 %v660_v7, %v1765_v0  ;;  %v734_v11 = vmax.f32 %v657_v4, 0.0 }
 0x16e   : > { %v735_v10 = vmax.f32 %v659_v6, 0.0 }
 0x16f   : > { %v736_v12 = vmax.f32 %v661_v8, 0.0 }
 0x170   : > { %v765_v13 = vpack.c.bf16 %v735_v10, %v733_v9 }
 0x171   : > { %v664_v14 = vpop.f32.mrb[4].mxu0  ;;  %v766_v15 = vpack.c.bf16 %v736_v12, %v734_v11 }
 0x172   : > { %v665_v16 = vadd.f32 %v664_v14, %v1763_v63  ;;  %v666_v17 = vpop.f32.mrb[5].mxu0 }
 0x173   : > { %v667_v18 = vadd.f32 %v666_v17, %v1765_v0  ;;  %v668_v19 = vpop.f32.mrb[6].mxu0  ;;  %948 = vmatprep.mubr.bf16.mxu1 %v766_v15 }
 0x174   : > { %v669_v20 = vadd.f32 %v668_v19, %v1763_v63  ;;  %v670_v21 = vpop.f32.mrb[7].mxu0  ;;  %949 = vmatmul.mubr.bf16.vlgmr.msra.gmra.mrb[0].mxu1 %v765_v13  ;;  %v737_v23 = vmax.f32 %v665_v16, 0.0 }
 0x175   : > { %v671_v22 = vadd.f32 %v670_v21, %v1765_v0  ;;  %v738_v25 = vmax.f32 %v667_v18, 0.0 }
 0x176   : > { %v739_v24 = vmax.f32 %v669_v20, 0.0 }
 0x177   : > { %v740_v26 = vmax.f32 %v671_v22, 0.0 }
 0x178   : > { %v767_v27 = vpack.c.bf16 %v739_v24, %v737_v23 }
 0x179   : > { %v768_v28 = vpack.c.bf16 %v740_v26, %v738_v25  ;;  %v674_v29 = vpop.f32.mrb[8].mxu0 }
 0x17a   : > { %v675_v30 = vadd.f32 %v674_v29, %v1763_v63  ;;  %v676_v31 = vpop.f32.mrb[9].mxu0 }
 0x17b   : > { %v677_v32 = vadd.f32 %v676_v31, %v1765_v0  ;;  %v678_v33 = vpop.f32.mrb[10].mxu0  ;;  %956 = vmatprep.mubr.bf16.mxu1 %v768_v28 }
 0x17c   : > { %v679_v34 = vadd.f32 %v678_v33, %v1763_v63  ;;  %v680_v35 = vpop.f32.mrb[11].mxu0  ;;  %957 = vmatmul.mubr.bf16.gmra.mrb[4].mxu1 %v767_v27  ;;  %v741_v37 = vmax.f32 %v675_v30, 0.0 }
 0x17d   : > { %v681_v36 = vadd.f32 %v680_v35, %v1765_v0  ;;  %v742_v39 = vmax.f32 %v677_v32, 0.0 }
 0x17e   : > { %v743_v38 = vmax.f32 %v679_v34, 0.0 }
 0x17f   : > { %v744_v40 = vmax.f32 %v681_v36, 0.0 }
 0x180   : > { %v769_v41 = vpack.c.bf16 %v743_v38, %v741_v37 }
 0x181   : > { %v770_v42 = vpack.c.bf16 %v744_v40, %v742_v39  ;;  %v684_v43 = vpop.f32.mrb[12].mxu0 }
 0x182   : > { %v685_v44 = vadd.f32 %v684_v43, %v1763_v63  ;;  %v686_v45 = vpop.f32.mrb[13].mxu0 }
 0x183   : > { %v687_v46 = vadd.f32 %v686_v45, %v1765_v0  ;;  %v688_v47 = vpop.f32.mrb[14].mxu0  ;;  %964 = vmatprep.mubr.bf16.mxu1 %v770_v42 }
 0x184   : > { %v689_v48 = vadd.f32 %v688_v47, %v1763_v63  ;;  %v690_v49 = vpop.f32.mrb[15].mxu0  ;;  %965 = vmatmul.mubr.bf16.gmra.mrb[8].mxu1 %v769_v41  ;;  %v745_v51 = vmax.f32 %v685_v44, 0.0 }
 0x185   : > { %v691_v50 = vadd.f32 %v690_v49, %v1765_v0  ;;  %v746_v53 = vmax.f32 %v687_v46, 0.0 }
 0x186   : > { %v747_v52 = vmax.f32 %v689_v48, 0.0 }
 0x187   : > { %v748_v54 = vmax.f32 %v691_v50, 0.0 }
 0x188   : > { %v771_v55 = vpack.c.bf16 %v747_v52, %v745_v51  ;;  %v1548_v52 = vmov 0.0|0.0  }
 0x189   : > { %v772_v56 = vpack.c.bf16 %v748_v54, %v746_v53  ;;  %v694_v57 = vpop.f32.mrb[16].mxu0  ;;  %1394 = vmatprep.subr.bf16.mxu0 %v1548_v52  ;;  %v1550_v53 = vmov 0.0  }
 0x18a   : > { %v695_v58 = vadd.f32 %v694_v57, %v1763_v63  ;;  %v696_v60 = vpop.f32.mrb[17].mxu0  ;;  %1391 = vmatprep.mubr.msk.f32.mxu0 %vm1549_vm5, %v1550_v53 }
 0x18b   : > { %v697_v61 = vadd.f32 %v696_v60, %v1765_v0  ;;  %v698_v62 = vpop.f32.mrb[18].mxu0  ;;  %972 = vmatprep.mubr.bf16.mxu1 %v772_v56 }
 0x18c   : > { %v699_v1 = vadd.f32 %v698_v62, %v1763_v63  ;;  %v700_v2 = vpop.f32.mrb[19].mxu0  ;;  %973 = vmatmul.mubr.bf16.gmra.mrb[12].mxu1 %v771_v55  ;;  %v749_v4 = vmax.f32 %v695_v58, 0.0 }
 0x18d   : > { %v701_v3 = vadd.f32 %v700_v2, %v1765_v0  ;;  %v750_v6 = vmax.f32 %v697_v61, 0.0 }
 0x18e   : > { %v751_v5 = vmax.f32 %v699_v1, 0.0 }
 0x18f   : > { %v752_v7 = vmax.f32 %v701_v3, 0.0 }
 0x190   : > { %v773_v8 = vpack.c.bf16 %v751_v5, %v749_v4 }
 0x191   : > { %v774_v9 = vpack.c.bf16 %v752_v7, %v750_v6  ;;  %v704_v10 = vpop.f32.mrb[20].mxu0 }
 0x192   : > { %v705_v11 = vadd.f32 %v704_v10, %v1763_v63  ;;  %v706_v12 = vpop.f32.mrb[21].mxu0 }
 0x193   : > { %v707_v13 = vadd.f32 %v706_v12, %v1765_v0  ;;  %v708_v14 = vpop.f32.mrb[22].mxu0  ;;  %980 = vmatprep.mubr.bf16.mxu1 %v774_v9 }
 0x194   : > { %v709_v15 = vadd.f32 %v708_v14, %v1763_v63  ;;  %v710_v16 = vpop.f32.mrb[23].mxu0  ;;  %981 = vmatmul.mubr.bf16.gmra.mrb[16].mxu1 %v773_v8  ;;  %v753_v18 = vmax.f32 %v705_v11, 0.0 }
 0x195   : > { %v711_v17 = vadd.f32 %v710_v16, %v1765_v0  ;;  %v754_v20 = vmax.f32 %v707_v13, 0.0 }
 0x196   : > { %v755_v19 = vmax.f32 %v709_v15, 0.0 }
 0x197   : > { %v756_v21 = vmax.f32 %v711_v17, 0.0 }
 0x198   : > { %v775_v22 = vpack.c.bf16 %v755_v19, %v753_v18 }
 0x199   : > { %v776_v23 = vpack.c.bf16 %v756_v21, %v754_v20  ;;  %v714_v24 = vpop.f32.mrb[24].mxu0 }
 0x19a   : > { %v715_v25 = vadd.f32 %v714_v24, %v1763_v63  ;;  %v716_v26 = vpop.f32.mrb[25].mxu0 }
 0x19b   : > { %v717_v27 = vadd.f32 %v716_v26, %v1765_v0  ;;  %v718_v28 = vpop.f32.mrb[26].mxu0  ;;  %988 = vmatprep.mubr.bf16.mxu1 %v776_v23 }
 0x19c   : > { %v719_v29 = vadd.f32 %v718_v28, %v1763_v63  ;;  %v720_v30 = vpop.f32.mrb[27].mxu0  ;;  %989 = vmatmul.mubr.bf16.gmra.mrb[20].mxu1 %v775_v22  ;;  %v757_v32 = vmax.f32 %v715_v25, 0.0 }
 0x19d   : > { %v721_v31 = vadd.f32 %v720_v30, %v1765_v0  ;;  %v758_v34 = vmax.f32 %v717_v27, 0.0 }
 0x19e   : > { %v759_v33 = vmax.f32 %v719_v29, 0.0 }
 0x19f   : > { %v760_v35 = vmax.f32 %v721_v31, 0.0 }
 0x1a0   : > { %v777_v36 = vpack.c.bf16 %v759_v33, %v757_v32 }
 0x1a1   : > { %v778_v37 = vpack.c.bf16 %v760_v35, %v758_v34  ;;  %v724_v38 = vpop.f32.mrb[28].mxu0 }
 0x1a2   : > { %v725_v39 = vadd.f32 %v724_v38, %v1763_v63  ;;  %v726_v40 = vpop.f32.mrb[29].mxu0 }
 0x1a3   : > { %v727_v41 = vadd.f32 %v726_v40, %v1765_v0  ;;  %v728_v42 = vpop.f32.mrb[30].mxu0  ;;  %996 = vmatprep.mubr.bf16.mxu1 %v778_v37 }
 0x1a4   : > { %v729_v43 = vadd.f32 %v728_v42, %v1763_v63  ;;  %v730_v44 = vpop.f32.mrb[31].mxu0  ;;  %997 = vmatmul.mubr.bf16.gmra.mrb[24].mxu1 %v777_v36  ;;  %v761_v46 = vmax.f32 %v725_v39, 0.0  ;;  %v1803_v63 = vld [vmem:[%s1857_s6] ss:$0 sm:$0xff] }
 0x1a5   : > { %v731_v45 = vadd.f32 %v730_v44, %v1765_v0  ;;  %v762_v48 = vmax.f32 %v727_v41, 0.0 }
 0x1a6   : > { %v763_v47 = vmax.f32 %v729_v43, 0.0 }
 0x1a7   : > { %v764_v49 = vmax.f32 %v731_v45, 0.0 }
 0x1a8   : > { %v779_v50 = vpack.c.bf16 %v763_v47, %v761_v46 }
 0x1a9   : > { %v780_v51 = vpack.c.bf16 %v764_v49, %v762_v48 }
 0x1ab   : > { %1004 = vmatprep.mubr.bf16.mxu1 %v780_v51 }
 0x1ac   : > { %1005 = vmatmul.mubr.bf16.gmra.mrb[28].mxu1 %v779_v50 }
 0x247   : > { %v1294_v54 = vpop.f32.mrb[0].mxu1 }
 0x248   : > { %v1295_v0 = vpop.f32.mrb[1].mxu1 }
 0x249   : > { %v1296_v55 = vadd.f32 %v1295_v0, %v1294_v54  ;;  %v1297_v56 = vpop.f32.mrb[2].mxu1 }
 0x24a   : > { %v1298_v57 = vpop.f32.mrb[3].mxu1 }
 0x24b   : > { %v951_v58 = vadd.f32 %v1296_v55, %v1803_v63  ;;  %v1299_v60 = vadd.f32 %v1298_v57, %v1297_v56 }
 0x24d   : > { %v954_v61 = vadd.f32 %v1299_v60, %v1803_v63  ;;  %v1013_v62 = vmax.f32 %v951_v58, 0.0 }
 0x24f   : > { %v1014_v1 = vmax.f32 %v954_v61, 0.0  ;;  %v1300_v2 = vpop.f32.mrb[4].mxu1 }
 0x250   : > { %v1301_v3 = vpop.f32.mrb[5].mxu1 }
 0x251   : > { %v1395_v4 = vpack.c.bf16 %v1014_v1, %v1013_v62  ;;  %v1302_v5 = vadd.f32 %v1301_v3, %v1300_v2  ;;  %v1303_v6 = vpop.f32.mrb[6].mxu1 }
 0x252   : > { %v1304_v7 = vpop.f32.mrb[7].mxu1 }
 0x253   : > { %v959_v8 = vadd.f32 %v1302_v5, %v1803_v63  ;;  %v1305_v9 = vadd.f32 %v1304_v7, %v1303_v6  ;;  %1396 = vmatpush3.bf16.msra.mxu0 %v1395_v4 }
 0x254   : > { %1397 = vmatprep.subr.bf16.mxu0 %v1548_v52 }
 0x255   : > { %v962_v10 = vadd.f32 %v1305_v9, %v1803_v63  ;;  %v1015_v11 = vmax.f32 %v959_v8, 0.0 }
 0x257   : > { %v1016_v12 = vmax.f32 %v962_v10, 0.0  ;;  %v1306_v13 = vpop.f32.mrb[8].mxu1 }
 0x258   : > { %v1307_v14 = vpop.f32.mrb[9].mxu1 }
 0x259   : > { %v1398_v15 = vpack.c.bf16 %v1016_v12, %v1015_v11  ;;  %v1308_v16 = vadd.f32 %v1307_v14, %v1306_v13  ;;  %v1309_v17 = vpop.f32.mrb[10].mxu1 }
 0x25a   : > { %v1310_v18 = vpop.f32.mrb[11].mxu1 }
 0x25b   : > { %v967_v19 = vadd.f32 %v1308_v16, %v1803_v63  ;;  %v1311_v20 = vadd.f32 %v1310_v18, %v1309_v17  ;;  %1399 = vmatpush3.bf16.msra.mxu0 %v1398_v15  ;;  %v1272_v18 = vld [vmem:[%s362_s13] ss:$0 sm:$0xff] }
 0x25c   : > { %1400 = vmatprep.subr.bf16.mxu0 %v1548_v52  ;;  %vm1036_vm6 = vcmp.eq.s32.totalorder %v1272_v18, %v1756_v59 }
 0x25d   : > { %v970_v21 = vadd.f32 %v1311_v20, %v1803_v63  ;;  %v1017_v22 = vmax.f32 %v967_v19, 0.0  ;;  %v1551_v20 = vmov 1.0  }
 0x25f   : > { %v1018_v23 = vmax.f32 %v970_v21, 0.0  ;;  %v1312_v24 = vpop.f32.mrb[12].mxu1  ;;  %v1039_v21 = vld [vmem:[#allocation2] sm:$0x7] }
 0x260   : > { %v1313_v25 = vpop.f32.mrb[13].mxu1 }
 0x261   : > { %v1401_v26 = vpack.c.bf16 %v1018_v23, %v1017_v22  ;;  %v1314_v27 = vadd.f32 %v1313_v25, %v1312_v24  ;;  %v1315_v28 = vpop.f32.mrb[14].mxu1 }
 0x262   : > { %v1316_v29 = vpop.f32.mrb[15].mxu1 }
 0x263   : > { %v975_v30 = vadd.f32 %v1314_v27, %v1803_v63  ;;  %v1317_v31 = vadd.f32 %v1316_v29, %v1315_v28  ;;  %1402 = vmatpush3.bf16.msra.mxu0 %v1401_v26 }
 0x264   : > { %1403 = vmatprep.subr.bf16.mxu0 %v1548_v52 }
 0x265   : > { %v978_v32 = vadd.f32 %v1317_v31, %v1803_v63  ;;  %v1019_v33 = vmax.f32 %v975_v30, 0.0 }
 0x267   : > { %v1020_v34 = vmax.f32 %v978_v32, 0.0  ;;  %v1318_v35 = vpop.f32.mrb[16].mxu1 }
 0x268   : > { %v1319_v36 = vpop.f32.mrb[17].mxu1 }
 0x269   : > { %v1404_v37 = vpack.c.bf16 %v1020_v34, %v1019_v33  ;;  %v1320_v38 = vadd.f32 %v1319_v36, %v1318_v35  ;;  %v1321_v39 = vpop.f32.mrb[18].mxu1 }
 0x26a   : > { %v1322_v40 = vpop.f32.mrb[19].mxu1 }
 0x26b   : > { %v983_v41 = vadd.f32 %v1320_v38, %v1803_v63  ;;  %v1323_v42 = vadd.f32 %v1322_v40, %v1321_v39  ;;  %1405 = vmatpush3.bf16.msra.mxu0 %v1404_v37 }
 0x26c   : > { %1406 = vmatprep.subr.bf16.mxu0 %v1548_v52 }
 0x26d   : > { %v986_v43 = vadd.f32 %v1323_v42, %v1803_v63  ;;  %v1021_v44 = vmax.f32 %v983_v41, 0.0 }
 0x26f   : > { %v1022_v45 = vmax.f32 %v986_v43, 0.0  ;;  %v1324_v46 = vpop.f32.mrb[20].mxu1 }
 0x270   : > { %v1325_v47 = vpop.f32.mrb[21].mxu1 }
 0x271   : > { %v1407_v48 = vpack.c.bf16 %v1022_v45, %v1021_v44  ;;  %v1326_v49 = vadd.f32 %v1325_v47, %v1324_v46  ;;  %v1327_v50 = vpop.f32.mrb[22].mxu1 }
 0x272   : > { %v1328_v51 = vpop.f32.mrb[23].mxu1 }
 0x273   : > { %v991_v53 = vadd.f32 %v1326_v49, %v1803_v63  ;;  %v1329_v54 = vadd.f32 %v1328_v51, %v1327_v50  ;;  %1408 = vmatpush3.bf16.msra.mxu0 %v1407_v48 }
 0x274   : > { %1409 = vmatprep.subr.bf16.mxu0 %v1548_v52 }
 0x275   : > { %v994_v0 = vadd.f32 %v1329_v54, %v1803_v63  ;;  %v1023_v55 = vmax.f32 %v991_v53, 0.0 }
 0x277   : > { %v1024_v56 = vmax.f32 %v994_v0, 0.0  ;;  %v1330_v57 = vpop.f32.mrb[24].mxu1 }
 0x278   : > { %v1331_v58 = vpop.f32.mrb[25].mxu1 }
 0x279   : > { %v1410_v60 = vpack.c.bf16 %v1024_v56, %v1023_v55  ;;  %v1332_v61 = vadd.f32 %v1331_v58, %v1330_v57  ;;  %v1333_v62 = vpop.f32.mrb[26].mxu1 }
 0x27a   : > { %v1334_v1 = vpop.f32.mrb[27].mxu1 }
 0x27b   : > { %v999_v2 = vadd.f32 %v1332_v61, %v1803_v63  ;;  %v1335_v3 = vadd.f32 %v1334_v1, %v1333_v62  ;;  %1411 = vmatpush3.bf16.msra.mxu0 %v1410_v60 }
 0x27c   : > { %1412 = vmatprep.subr.bf16.mxu0 %v1548_v52 }
 0x27d   : > { %v1002_v4 = vadd.f32 %v1335_v3, %v1803_v63  ;;  %v1025_v5 = vmax.f32 %v999_v2, 0.0 }
 0x27f   : > { %v1026_v6 = vmax.f32 %v1002_v4, 0.0  ;;  %v1336_v7 = vpop.f32.mrb[28].mxu1 }
 0x280   : > { %v1337_v8 = vpop.f32.mrb[29].mxu1 }
 0x281   : > { %v1413_v9 = vpack.c.bf16 %v1026_v6, %v1025_v5  ;;  %v1338_v10 = vadd.f32 %v1337_v8, %v1336_v7  ;;  %v1339_v11 = vpop.f32.mrb[30].mxu1 }
 0x282   : > { %v1340_v12 = vpop.f32.mrb[31].mxu1 }
 0x283   : > { %v1007_v13 = vadd.f32 %v1338_v10, %v1803_v63  ;;  %v1341_v14 = vadd.f32 %v1340_v12, %v1339_v11  ;;  %1414 = vmatpush3.bf16.msra.mxu0 %v1413_v9 }
 0x284   : > { %1415 = vmatprep.subr.bf16.mxu0 %v1548_v52 }
 0x285   : > { %v1010_v15 = vadd.f32 %v1341_v14, %v1803_v63  ;;  %v1027_v16 = vmax.f32 %v1007_v13, 0.0 }
 0x287   : > { %v1028_v17 = vmax.f32 %v1010_v15, 0.0 }
 0x289   : > { %v1416_v19 = vpack.c.bf16 %v1028_v17, %v1027_v16 }
 0x28b   : > { %1417 = vmatpush3.bf16.msra.mxu0 %v1416_v19 }
 0x28e   : > { %1392 = vmatmul.mubr.msk.f32.vlgmr.msra.gmra.mrb[32].mxu0 %vm1036_vm6, %v1551_v20 }
 0x35e   : > { %1116 = sbr.rel (%p1275_p9) target bundleno = 877 (0x36d), region = 56 }
 0x361   : > { %v1106_v22 = vpop.f32.mrb[32].mxu0 }
 0x362   : > { %v1110_v23 = vadd.f32 %v1106_v22, %v1039_v21  ;;  %v1393_v52 = vpop.f32.mrb[33].mxu0 }
 0x364   : > { %1112 = vst.msk [vmem:[#allocation2] sm:$0x7] %vm1111_vm7, %v1110_v23 }
 0x36b   : > { %v1117_v63 = vld [vmem:[#allocation2] sm:$0x7] }
 0x36c   : > { %1118 = vst.msk [vmem:[%s1642_s8] sm:$0x7] %vm1111_vm7, %v1117_v63 }
 0x36d PF: > { %s17_s28 = sadd.s32 1, %s1543_s28   ;;  %s1859_s24 = smov %s1535_s26 }
 0x36e   : > { %p14_p10 = scmp.ge.s32.totalorder %s17_s28, 6   ;;  %s1860_s25 = smov %s1539_s27 }
 0x36f   : > { %s1861_s26 = smov %s1864_s29  ;;  %s1862_s27 = smov %s1868_s30 }
 0x370   :  { %16 = sbr.rel (!%p14_p10) target bundleno = 3 (0x3), region = 92 }

</bundles_post_ra>
